<compile_context>
chip_gen: v7x
topology: tpu7x:2x2x1
jax: 0.10.0
libtpu: 0.0.40
codegen_flags: <defaults>
</compile_context>

<pallas_src>
import functools

import jax
import jax.numpy as jnp
from jax import lax
from jax.experimental import pallas as pl
from jax.experimental.pallas import tpu as pltpu

_TB_ALIGN = 32   # batch-tile granularity: clean sublane packing for int8/bool masks
_LANE = 128


def _round_up(x, m):
    return ((x + m - 1) // m) * m


def _coord_loss_kernel(*refs, inv_denom, expand_mask):
    if expand_mask:
        o1_ref, o2_ref, g1_ref, g2_ref, v1_ref, v2_ref, e_ref, out_ref = refs
    else:
        o1_ref, o2_ref, g1_ref, g2_ref, v1_ref, v2_ref, out_ref = refs

    f32 = jnp.float32
    o1 = o1_ref[...].astype(f32)
    o2 = o2_ref[...].astype(f32)
    g1 = g1_ref[...].astype(f32)
    g2 = g2_ref[...].astype(f32)
    v1 = v1_ref[...].astype(f32)
    v2 = v2_ref[...].astype(f32)

    if expand_mask:
        # Expand per-joint masks (TB, J) -> per-element masks (TB, J*C) with a
        # precomputed 0/1 block-diagonal matrix E (J, N) on the otherwise idle
        # MXU.  E uses a constant block index so it is DMA'd once and stays
        # resident.  Exact for 0/1 validity masks in any MXU precision (single
        # non-zero term, weight 1.0).
        e = e_ref[...]
        v1 = jnp.dot(v1, e, preferred_element_type=f32)
        v2 = jnp.dot(v2, e, preferred_element_type=f32)

    # Elementwise hot path on the VPU; lane reductions on the XLU.
    t1 = jnp.abs(o1 - g1) * v1 + jnp.abs(o2 - g2) * v2
    t2 = jnp.abs(o1 - g2) * v2 + jnp.abs(o2 - g1) * v1
    loss1 = jnp.sum(t1, axis=-1, keepdims=True) * inv_denom   # (TB, 1)
    loss2 = jnp.sum(t2, axis=-1, keepdims=True) * inv_denom   # (TB, 1)

    # Single full-tile store: lane 0 = min(loss1, loss2), lane 1 = (loss1 < loss2).
    minv = jnp.minimum(loss1, loss2)
    ordv = (loss1 < loss2).astype(f32)
    lane_idx = lax.broadcasted_iota(jnp.int32, (minv.shape[0], 2), 1)
    out_ref[...] = jnp.where(lane_idx == 0, minv, ordv)


def coord_loss_order_invariant(coord_out_e1, coord_out_e2,
                               coord_gt_e1, coord_gt_e2,
                               valid_e1, valid_e2,
                               is_3D=None, return_order=False):
    """JAX/Pallas equivalent of CoordLossOrderInvariant.forward.

    `is_3D` is accepted but unused, matching the PyTorch module.
    """
    del is_3D
    coord_out_e1 = jnp.asarray(coord_out_e1)
    B, J, C = coord_out_e1.shape
    N = J * C
    inv_denom = 1.0 / float(N)

    valid_e1 = jnp.asarray(valid_e1)
    valid_e2 = jnp.asarray(valid_e2)
    per_joint = (valid_e1.ndim == 2) or (valid_e1.ndim == 3 and valid_e1.shape[-1] == 1)

    def prep_mask(v):
        # Keep the narrow native dtype on the wire (bool -> int8 for a clean
        # memref dtype); the cast to f32 happens after the VMEM load.
        v = jnp.asarray(v)
        if v.dtype == jnp.bool_:
            v = v.astype(jnp.int8)
        if per_joint:
            if v.ndim == 3:
                v = v[..., 0]
            return jnp.broadcast_to(v, (B, J))
        return jnp.broadcast_to(v, (B, J, C)).reshape(B, N)

    coords = [jnp.asarray(x).reshape(B, N)   # contiguous reshape: free
              for x in (coord_out_e1, coord_out_e2, coord_gt_e1, coord_gt_e2)]
    masks = [prep_mask(valid_e1), prep_mask(valid_e2)]
    Jm = J if per_joint else N

    # Tiny batches only: pad up to one 32-row tile (negligible bytes).  Larger
    # batches are NOT padded -- the ragged last block is handled by Pallas
    # (row-independent math; out-of-bounds output rows are never read back).
    Bp = B
    if B < _TB_ALIGN:
        Bp = _TB_ALIGN
        coords = [jnp.pad(x, ((0, Bp - B), (0, 0))) for x in coords]
        masks = [jnp.pad(v, ((0, Bp - B), (0, 0))) for v in masks]

    # --- batch-tile size: generation-aware VMEM budget ----------------------
    try:
        info = pltpu.get_tpu_info()
        vmem_cap = int(getattr(info, "vmem_capacity_bytes", 0)) or 64 * 1024 * 1024
    except Exception:  # no TPU info available -> conservative v7x value
        vmem_cap = 64 * 1024 * 1024
    input_budget = vmem_cap // 2          # double-buffered input tiles
    vmem_limit = (vmem_cap * 3) // 4      # ~25% headroom for compiler scratch

    n_pad = _round_up(N, _LANE)
    j_pad = _round_up(Jm, _LANE)
    coord_bytes = sum(jnp.dtype(x.dtype).itemsize for x in coords)
    mask_bytes = sum(jnp.dtype(v.dtype).itemsize for v in masks)
    bytes_per_row = 2 * (n_pad * coord_bytes + j_pad * mask_bytes) + 2 * _LANE * 4
    tb_budget = max(_TB_ALIGN,
                    (input_budget // bytes_per_row) // _TB_ALIGN * _TB_ALIGN)
    # Keep >= 4 grid blocks when possible: v7x has 2 TensorCores, and every
    # generation needs >= 2 steps for DMA/compute overlap.
    tb_steps = max(_TB_ALIGN, _round_up(pl.cdiv(Bp, 4), _TB_ALIGN))
    tb = int(min(tb_budget, tb_steps))

    grid = (pl.cdiv(Bp, tb),)
    coord_spec = pl.BlockSpec((tb, N), lambda i: (i, 0))
    mask_spec = pl.BlockSpec((tb, Jm), lambda i: (i, 0))
    out_spec = pl.BlockSpec((tb, 2), lambda i: (i, 0))

    in_arrays = coords + masks
    in_specs = [coord_spec] * 4 + [mask_spec] * 2
    if per_joint:
        # 0/1 block-diagonal expansion matrix, built once in the wrapper.
        j_idx = jnp.arange(J, dtype=jnp.int32)[:, None]
        n_idx = jnp.arange(N, dtype=jnp.int32)[None, :]
        expand = ((n_idx // C) == j_idx).astype(jnp.float32)        # (J, N)
        in_arrays.append(expand)
        in_specs.append(pl.BlockSpec((J, N), lambda i: (0, 0)))     # resident

    out = pl.pallas_call(
        functools.partial(_coord_loss_kernel, inv_denom=inv_denom,
                          expand_mask=per_joint),
        out_shape=jax.ShapeDtypeStruct((Bp, 2), jnp.float32),
        grid=grid,
        in_specs=in_specs,
        out_specs=out_spec,
        compiler_params=pltpu.CompilerParams(
            dimension_semantics=("parallel",),
            vmem_limit_bytes=int(vmem_limit)),
    )(*in_arrays)

    loss_pf = out[:B, 0]
    if return_order:
        return loss_pf, out[:B, 1]
    return loss_pf


def _reference(o1, o2, g1, g2, v1, v2):
    f32 = jnp.float32
    o1, o2, g1, g2 = (jnp.asarray(x).astype(f32) for x in (o1, o2, g1, g2))

    def bx(v):
        v = jnp.asarray(v).astype(f32)
        if v.ndim == 2:
            v = v[:, :, None]
        return jnp.broadcast_to(v, o1.shape)

    v1 = bx(v1)
    v2 = bx(v2)
    loss1 = jnp.mean(jnp.abs(o1 - g1) * v1 + jnp.abs(o2 - g2) * v2, axis=(1, 2))
    loss2 = jnp.mean(jnp.abs(o1 - g2) * v2 + jnp.abs(o2 - g1) * v1, axis=(1, 2))
    return jnp.minimum(loss1, loss2), (loss1 < loss2).astype(f32)


def _check(B, J, C, seed, mask_kind):
    key = jax.random.PRNGKey(seed)
    k = jax.random.split(key, 6)
    o1 = jax.random.normal(k[0], (B, J, C), jnp.float32)
    o2 = jax.random.normal(k[1], (B, J, C), jnp.float32)
    g1 = jax.random.normal(k[2], (B, J, C), jnp.float32)
    g2 = jax.random.normal(k[3], (B, J, C), jnp.float32)
    if mask_kind == "per_joint_f32":
        v1 = (jax.random.uniform(k[4], (B, J, 1)) > 0.2).astype(jnp.float32)
        v2 = (jax.random.uniform(k[5], (B, J, 1)) > 0.2).astype(jnp.float32)
    elif mask_kind == "per_joint_bool":
        v1 = jax.random.uniform(k[4], (B, J)) > 0.2
        v2 = jax.random.uniform(k[5], (B, J)) > 0.2
    else:  # per-element float masks
        v1 = (jax.random.uniform(k[4], (B, J, C)) > 0.2).astype(jnp.float32)
        v2 = (jax.random.uniform(k[5], (B, J, C)) > 0.2).astype(jnp.float32)

    loss_pf, pred_order = coord_loss_order_invariant(
        o1, o2, g1, g2, v1, v2, return_order=True)
    jax.block_until_ready((loss_pf, pred_order))

    ref_loss, ref_order = _reference(o1, o2, g1, g2, v1, v2)
    assert jnp.allclose(loss_pf, ref_loss, rtol=1e-5, atol=1e-6), (loss_pf, ref_loss)
    assert jnp.array_equal(pred_order, ref_order), (pred_order, ref_order)


if __name__ == "__main__":
    # batch=2, joints=16, coord-dim=3; per-joint (B, J, 1) f32 validity masks.
    _check(B=2, J=16, C=3, seed=0, mask_kind="per_joint_f32")
    # tiny padded batch, bool per-joint masks streamed as int8.
    _check(B=5, J=24, C=2, seed=1, mask_kind="per_joint_bool")
    # batch > 32 and not a tile multiple: unpadded ragged last block, per-element masks.
    _check(B=40, J=17, C=3, seed=2, mask_kind="per_element_f32")
    print("KERNEL_OK")
</pallas_src>

<mosaic_0001>
module attributes {stable_mosaic.version = 11 : i64} {
  func.func @_coord_loss_kernel(%arg0: i32, %arg1: memref<32x48xf32, #tpu.memory_space<vmem>>, %arg2: memref<32x48xf32, #tpu.memory_space<vmem>>, %arg3: memref<32x48xf32, #tpu.memory_space<vmem>>, %arg4: memref<32x48xf32, #tpu.memory_space<vmem>>, %arg5: memref<32x16xf32, #tpu.memory_space<vmem>>, %arg6: memref<32x16xf32, #tpu.memory_space<vmem>>, %arg7: memref<16x48xf32, #tpu.memory_space<vmem>>, %arg8: memref<32x2xf32, #tpu.memory_space<vmem>>) attributes {dimension_semantics = [#tpu.dimension_semantics<parallel>], iteration_bounds = array<i64: 1>, scalar_prefetch = 0 : i64, scratch_operands = 0 : i64, tpu.core_type = #tpu.core_type<tc>, window_params = [{transform_indices = @transform_0, window_bounds = array<i64: 32, 48>}, {transform_indices = @transform_1, window_bounds = array<i64: 32, 48>}, {transform_indices = @transform_2, window_bounds = array<i64: 32, 48>}, {transform_indices = @transform_3, window_bounds = array<i64: 32, 48>}, {transform_indices = @transform_4, window_bounds = array<i64: 32, 16>}, {transform_indices = @transform_5, window_bounds = array<i64: 32, 16>}, {pipeline_mode = #tpu.pipeline_mode<synchronous>, transform_indices = @transform_6, window_bounds = array<i64: 16, 48>}, {transform_indices = @transform_7, window_bounds = array<i64: 32, 2>}]} {
    %c0 = arith.constant 0 : index
    %c0_0 = arith.constant 0 : index
    %0 = vector.load %arg1[%c0, %c0_0] : memref<32x48xf32, #tpu.memory_space<vmem>>, vector<32x48xf32>
    %c0_1 = arith.constant 0 : index
    %c0_2 = arith.constant 0 : index
    %1 = vector.load %arg2[%c0_1, %c0_2] : memref<32x48xf32, #tpu.memory_space<vmem>>, vector<32x48xf32>
    %c0_3 = arith.constant 0 : index
    %c0_4 = arith.constant 0 : index
    %2 = vector.load %arg3[%c0_3, %c0_4] : memref<32x48xf32, #tpu.memory_space<vmem>>, vector<32x48xf32>
    %c0_5 = arith.constant 0 : index
    %c0_6 = arith.constant 0 : index
    %3 = vector.load %arg4[%c0_5, %c0_6] : memref<32x48xf32, #tpu.memory_space<vmem>>, vector<32x48xf32>
    %c0_7 = arith.constant 0 : index
    %c0_8 = arith.constant 0 : index
    %4 = vector.load %arg5[%c0_7, %c0_8] : memref<32x16xf32, #tpu.memory_space<vmem>>, vector<32x16xf32>
    %c0_9 = arith.constant 0 : index
    %c0_10 = arith.constant 0 : index
    %5 = vector.load %arg6[%c0_9, %c0_10] : memref<32x16xf32, #tpu.memory_space<vmem>>, vector<32x16xf32>
    %c0_11 = arith.constant 0 : index
    %c0_12 = arith.constant 0 : index
    %6 = vector.load %arg7[%c0_11, %c0_12] : memref<16x48xf32, #tpu.memory_space<vmem>>, vector<16x48xf32>
    %cst = arith.constant dense<0.000000e+00> : vector<32x48xf32>
    %7 = tpu.matmul %4, %6, %cst {dimension_numbers = #tpu.dot_dimension_numbers<[1], [0], [0], [1], [0, 0, 1, 1], [], []>} : vector<32x16xf32>, vector<16x48xf32>, vector<32x48xf32> -> vector<32x48xf32>
    %cst_13 = arith.constant dense<0.000000e+00> : vector<32x48xf32>
    %8 = tpu.matmul %5, %6, %cst_13 {dimension_numbers = #tpu.dot_dimension_numbers<[1], [0], [0], [1], [0, 0, 1, 1], [], []>} : vector<32x16xf32>, vector<16x48xf32>, vector<32x48xf32> -> vector<32x48xf32>
    %9 = arith.subf %0, %2 : vector<32x48xf32>
    %10 = math.absf %9 : vector<32x48xf32>
    %11 = arith.mulf %10, %7 : vector<32x48xf32>
    %12 = arith.subf %1, %3 : vector<32x48xf32>
    %13 = math.absf %12 : vector<32x48xf32>
    %14 = arith.mulf %13, %8 : vector<32x48xf32>
    %15 = arith.addf %11, %14 : vector<32x48xf32>
    %16 = arith.subf %0, %3 : vector<32x48xf32>
    %17 = math.absf %16 : vector<32x48xf32>
    %18 = arith.mulf %17, %8 : vector<32x48xf32>
    %19 = arith.subf %1, %2 : vector<32x48xf32>
    %20 = math.absf %19 : vector<32x48xf32>
    %21 = arith.mulf %20, %7 : vector<32x48xf32>
    %22 = arith.addf %18, %21 : vector<32x48xf32>
    %cst_14 = arith.constant dense<0.000000e+00> : vector<32xf32>
    %23 = vector.multi_reduction <add>, %15, %cst_14 [1] : vector<32x48xf32> to vector<32xf32>
    %24 = vector.shape_cast %23 : vector<32xf32> to vector<32x1xf32>
    %cst_15 = arith.constant 0.020833334 : f32
    %25 = vector.broadcast %cst_15 : f32 to vector<32x1xf32>
    %26 = arith.mulf %24, %25 : vector<32x1xf32>
    %cst_16 = arith.constant dense<0.000000e+00> : vector<32xf32>
    %27 = vector.multi_reduction <add>, %22, %cst_16 [1] : vector<32x48xf32> to vector<32xf32>
    %28 = vector.shape_cast %27 : vector<32xf32> to vector<32x1xf32>
    %cst_17 = arith.constant 0.020833334 : f32
    %29 = vector.broadcast %cst_17 : f32 to vector<32x1xf32>
    %30 = arith.mulf %28, %29 : vector<32x1xf32>
    %31 = arith.minimumf %26, %30 : vector<32x1xf32>
    %32 = arith.cmpf olt, %26, %30 : vector<32x1xf32>
    %33 = arith.extui %32 : vector<32x1xi1> to vector<32x1xi32>
    %34 = arith.sitofp %33 : vector<32x1xi32> to vector<32x1xf32>
    %35 = tpu.iota {dimensions = array<i32: 1>} : vector<32x2xi32>
    %c0_i32 = arith.constant 0 : i32
    %36 = vector.broadcast %c0_i32 : i32 to vector<32x2xi32>
    %37 = arith.cmpi eq, %35, %36 : vector<32x2xi32>
    %38 = vector.shape_cast %31 : vector<32x1xf32> to vector<32x1xf32>
    %39 = vector.broadcast %38 : vector<32x1xf32> to vector<32x2xf32>
    %40 = vector.shape_cast %34 : vector<32x1xf32> to vector<32x1xf32>
    %41 = vector.broadcast %40 : vector<32x1xf32> to vector<32x2xf32>
    %42 = arith.select %37, %39, %41 : vector<32x2xi1>, vector<32x2xf32>
    %c0_18 = arith.constant 0 : index
    %c0_19 = arith.constant 0 : index
    %43 = vector.load %arg8[%c0_18, %c0_19] : memref<32x2xf32, #tpu.memory_space<vmem>>, vector<32x2xf32>
    tpu.vector_store %arg8[%c0_18, %c0_19], %42 {strides = array<i32>} : memref<32x2xf32, #tpu.memory_space<vmem>>, vector<32x2xf32>,
    return
  }
  func.func @transform_0(%arg0: i32) -> (i32, i32) {
    %c0_i32 = arith.constant 0 : i32
    %c0_i32_0 = arith.constant 0 : i32
    return %arg0, %c0_i32 : i32, i32
  }
  func.func @transform_1(%arg0: i32) -> (i32, i32) {
    %c0_i32 = arith.constant 0 : i32
    %c0_i32_0 = arith.constant 0 : i32
    return %arg0, %c0_i32 : i32, i32
  }
  func.func @transform_2(%arg0: i32) -> (i32, i32) {
    %c0_i32 = arith.constant 0 : i32
    %c0_i32_0 = arith.constant 0 : i32
    return %arg0, %c0_i32 : i32, i32
  }
  func.func @transform_3(%arg0: i32) -> (i32, i32) {
    %c0_i32 = arith.constant 0 : i32
    %c0_i32_0 = arith.constant 0 : i32
    return %arg0, %c0_i32 : i32, i32
  }
  func.func @transform_4(%arg0: i32) -> (i32, i32) {
    %c0_i32 = arith.constant 0 : i32
    %c0_i32_0 = arith.constant 0 : i32
    return %arg0, %c0_i32 : i32, i32
  }
  func.func @transform_5(%arg0: i32) -> (i32, i32) {
    %c0_i32 = arith.constant 0 : i32
    %c0_i32_0 = arith.constant 0 : i32
    return %arg0, %c0_i32 : i32, i32
  }
  func.func @transform_6(%arg0: i32) -> (i32, i32) {
    %c0_i32 = arith.constant 0 : i32
    %c0_i32_0 = arith.constant 0 : i32
    %c0_i32_1 = arith.constant 0 : i32
    return %c0_i32, %c0_i32_0 : i32, i32
  }
  func.func @transform_7(%arg0: i32) -> (i32, i32) {
    %c0_i32 = arith.constant 0 : i32
    %c0_i32_0 = arith.constant 0 : i32
    return %arg0, %c0_i32 : i32, i32
  }
}

</mosaic_0001>

<bundles_post_ra>
// kernel: tpu_custom_call.1
= control target key start
LH: loop header
LB: loop body
LE: loop exit
PB: predicated region body
PF: predicated region fallthrough
CT: control target
= control target key end

     0   :  { %12 = vsyncpa [#allocation3], 0  ;;  %s668_s0 = inlined_call_operand.vmem [shape: f32[32,48], index: 0, kind: input, shape index: {}]   ;;  %s669_s1 = inlined_call_operand.vmem [shape: f32[32,48], index: 1, kind: input, shape index: {}]   ;;  %s670_s2 = inlined_call_operand.vmem [shape: f32[32,48], index: 2, kind: input, shape index: {}]   ;;  %s671_s3 = inlined_call_operand.hbm [shape: f32[32,48], index: 3, kind: input, shape index: {}]   ;;  %s672_s4 = inlined_call_operand.vmem [shape: f32[32,16], index: 4, kind: input, shape index: {}]   ;;  %s673_s5 = inlined_call_operand.vmem [shape: f32[32,16], index: 5, kind: input, shape index: {}]   ;;  %s674_s6 = inlined_call_operand.hbm [shape: f32[16,48], index: 6, kind: input, shape index: {}]   ;;  %s675_s7 = inlined_call_operand.vmem [shape: f32[32,2], index: 7, kind: output, shape index: {}]  }
   0x1   :  { %13 = vsyncpa [#allocation5], 0  ;;  %s503_s24 = smov [#allocation2]   ;;  %s455_s28 = scalar_lea.hbm %s671_s3, 512 }
   0x2   :  { %s25_s25 = sshll.u32 %s503_s24, 4  ;;  %p456_p0 = scmp.ne.s32.totalorder %s671_s3, %s455_s28  ;;  %s26_s25 = int_to_ptr.vmem [resolvable:$true] %s25_s25 }
   0x3   :  { %p459_p1 = scmp.lt.u32.totalorder %s455_s28, %s671_s3 }
   0x5   :  { %p461_p2 = pnand %p459_p1, %p456_p0 }
   0x7   :  { %464 = shalt.err (!%p461_p2)
}
   0x8   :  { %s465_s10 = scalar_lea.vmem %s26_s25, 512  ;;  %p470_p4 = scmp.lt.s32.totalorder %s26_s25, %s26_s25 }
   0x9   :  { %p466_p3 = scmp.ne.s32.totalorder %s26_s25, %s465_s10  ;;  %p471_p5 = scmp.lt.s32.totalorder %s465_s10, %s465_s10 }
   0xb   :  { %p472_p6 = por %p471_p5, %p470_p4 }
   0xd   :  { %p473_p7 = pnand %p472_p6, %p466_p3 }
   0xf   :  { %476 = shalt.err (!%p473_p7)
}
  0x10   :  { %s504_s11 = smov 128   ;;  %s505_s12 = smov 8  }
  0x11   :  { %31 = dma.hbm_to_vmem [thread:$0]  %s671_s3, 512, %s26_s25, [#allocation3], %s504_s11, %s504_s11, %s505_s12  }
  0x12   :  { %s506_s15 = smov [#allocation4]   ;;  %s477_s19 = scalar_lea.hbm %s674_s6, 256 }
  0x13   :  { %s41_s16 = sshll.u32 %s506_s15, 4  ;;  %p478_p8 = scmp.ne.s32.totalorder %s674_s6, %s477_s19  ;;  %s42_s16 = int_to_ptr.vmem [resolvable:$true] %s41_s16 }
  0x14   :  { %p481_p9 = scmp.lt.u32.totalorder %s477_s19, %s674_s6 }
  0x16   :  { %p483_p10 = pnand %p481_p9, %p478_p8 }
  0x18   :  { %486 = shalt.err (!%p483_p10)
}
  0x19   :  { %s487_s24 = scalar_lea.vmem %s42_s16, 256  ;;  %p492_p12 = scmp.lt.s32.totalorder %s42_s16, %s42_s16 }
  0x1a   :  { %p488_p11 = scmp.ne.s32.totalorder %s42_s16, %s487_s24  ;;  %p493_p13 = scmp.lt.s32.totalorder %s487_s24, %s487_s24 }
  0x1c   :  { %p494_p0 = por %p493_p13, %p492_p12 }
  0x1e   :  { %p495_p1 = pnand %p494_p0, %p488_p11 }
  0x20   :  { %498 = shalt.err (!%p495_p1)
}
  0x21   :  { %47 = dma.hbm_to_vmem [thread:$0]  %s674_s6, 256, %s42_s16, [#allocation5], %s504_s11, %s504_s11, %s505_s12  }
  0x22   :  { %499 = dma.done.wait [#allocation3], 512  }
  0x23   :  { %500 = vsyncadd [#allocation3], 4294966784 }
  0x24   :  { %501 = dma.done.wait [#allocation5], 256  }
  0x25   :  { %502 = vsyncadd [#allocation5], 4294967040  ;;  %vm80_vm0 = vcmask 130048   ;;  %v78_v0 = vld [vmem:[#allocation4] sm:$0xff]  ;;  %v79_v1 = vld [vmem:[#allocation4 + $0x8] sm:$0xff]  ;;  %vm331_vm1 = vcmask 392192  }
  0x26   :  { %v70_v2 = vld [vmem:[%s672_s4] sm:$0xff]  ;;  %v442_v3 = vpack.c.bf16 %v79_v1, %v78_v0  ;;  %v71_v5 = vld [vmem:[%s672_s4 + $0x8] sm:$0xff]  ;;  %v72_v7 = vld [vmem:[%s672_s4 + $0x10] sm:$0xff]  ;;  %vm387_vm3 = vcmask 15360  }
  0x27   :  { %426 = vmatprep.mubr.msk.f32.mxu0 %vm80_vm0, %v70_v2  ;;  %v74_v4 = vld [vmem:[%s673_s5] sm:$0xff]  ;;  %v75_v6 = vld [vmem:[%s673_s5 + $0x8] sm:$0xff]  ;;  %v76_v8 = vld [vmem:[%s673_s5 + $0x10] sm:$0xff] }
  0x28   :  { %436 = vmatprep.mubr.msk.f32.mxu1 %vm80_vm0, %v74_v4  ;;  %443 = vmatprep.subr.bf16.mxu0 %v442_v3  ;;  %v73_v9 = vld [vmem:[%s672_s4 + $0x18] sm:$0xff]  ;;  %v55_v11 = vld [vmem:[%s668_s0 + $0x8] sm:$0xff]  ;;  %v54_v16 = vld [vmem:[%s668_s0] sm:$0xff] }
  0x29   :  { %447 = vmatprep.subr.bf16.mxu1 %v442_v3  ;;  %445 = vmatpush3.bf16.msra.mxu0 %v442_v3  ;;  %v77_v10 = vld [vmem:[%s673_s5 + $0x18] sm:$0xff]  ;;  %v63_v12 = vld [vmem:[%s670_s2 + $0x8] sm:$0xff]  ;;  %v62_v17 = vld [vmem:[%s670_s2] sm:$0xff] }
  0x2a   :  { %449 = vmatpush3.bf16.msra.mxu1 %v442_v3  ;;  %v59_v13 = vld [vmem:[%s669_s1 + $0x8] sm:$0xff]  ;;  %v276_v15 = vsub.f32 %v55_v11, %v63_v12  ;;  %v58_v19 = vld [vmem:[%s669_s1] sm:$0xff]  ;;  %v57_v21 = vld [vmem:[%s668_s0 + $0x18] sm:$0xff]  ;;  %v275_v27 = vsub.f32 %v54_v16, %v62_v17 }
  0x2b   :  { %v67_v14 = vld [vmem:[#allocation2 + $0x8] sm:$0xff]  ;;  %v316_v18 = vsub.f32 %v59_v13, %v63_v12  ;;  %v66_v20 = vld [vmem:[#allocation2] sm:$0xff]  ;;  %v61_v23 = vld [vmem:[%s669_s1 + $0x18] sm:$0xff]  ;;  %v315_v32 = vsub.f32 %v58_v19, %v62_v17 }
  0x2c   :  { %427 = vmatmul.mubr.msk.f32.vlgmr.msra.gmra.mrb[0].mxu0 %vm80_vm0, %v71_v5  ;;  %v288_v22 = vsub.f32 %v59_v13, %v67_v14  ;;  %v65_v24 = vld [vmem:[%s670_s2 + $0x18] sm:$0xff]  ;;  %v304_v26 = vsub.f32 %v55_v11, %v67_v14  ;;  %v56_v28 = vld [vmem:[%s668_s0 + $0x10] sm:$0xff]  ;;  %v280_v31 = vand.u32 2147483647, %v276_v15  ;;  %v287_v33 = vsub.f32 %v58_v19, %v66_v20 }
  0x2d   :  { %437 = vmatmul.mubr.msk.f32.vlgmr.msra.gmra.mrb[0].mxu1 %vm80_vm0, %v75_v6  ;;  %429 = vmatprep.mubr.msk.f32.mxu0 %vm80_vm0, %v72_v7  ;;  %v69_v25 = vld [vmem:[#allocation2 + $0x18] sm:$0xff]  ;;  %v60_v29 = vld [vmem:[%s669_s1 + $0x10] sm:$0xff]  ;;  %v303_v34 = vsub.f32 %v54_v16, %v66_v20  ;;  %v320_v36 = vand.u32 2147483647, %v316_v18  ;;  %v278_v37 = vsub.f32 %v57_v21, %v65_v24  ;;  %v318_v38 = vsub.f32 %v61_v23, %v65_v24 }
  0x2e   :  { %439 = vmatprep.mubr.msk.f32.mxu1 %vm80_vm0, %v76_v8  ;;  %v64_v30 = vld [vmem:[%s670_s2 + $0x10] sm:$0xff]  ;;  %v290_v39 = vsub.f32 %v61_v23, %v69_v25  ;;  %v292_v40 = vand.u32 2147483647, %v288_v22  ;;  %v306_v41 = vsub.f32 %v57_v21, %v69_v25  ;;  %v308_v44 = vand.u32 2147483647, %v304_v26 }
  0x2f   :  { %v68_v35 = vld [vmem:[#allocation2 + $0x10] sm:$0xff]  ;;  %v277_v42 = vsub.f32 %v56_v28, %v64_v30  ;;  %v317_v43 = vsub.f32 %v60_v29, %v64_v30  ;;  %v279_v45 = vand.u32 2147483647, %v275_v27  ;;  %v319_v48 = vand.u32 2147483647, %v315_v32 }
  0x30   :  { %430 = vmatmul.mubr.msk.f32.gmra.mrb[2].mxu0 %vm80_vm0, %v73_v9  ;;  %v289_v46 = vsub.f32 %v60_v29, %v68_v35  ;;  %v305_v47 = vsub.f32 %v56_v28, %v68_v35  ;;  %v291_v49 = vand.u32 2147483647, %v287_v33  ;;  %v307_v50 = vand.u32 2147483647, %v303_v34 }
  0x31   :  { %440 = vmatmul.mubr.msk.f32.gmra.mrb[2].mxu1 %vm80_vm0, %v77_v10  ;;  %v282_v51 = vand.u32 2147483647, %v278_v37  ;;  %v322_v52 = vand.u32 2147483647, %v318_v38  ;;  %v294_v53 = vand.u32 2147483647, %v290_v39  ;;  %v380_v35 = vlaneseq }
  0x32   :  { %v310_v54 = vand.u32 2147483647, %v306_v41  ;;  %v281_v55 = vand.u32 2147483647, %v277_v42  ;;  %v321_v56 = vand.u32 2147483647, %v317_v43 }
  0x33   :  { %v293_v59 = vand.u32 2147483647, %v289_v46  ;;  %v309_v60 = vand.u32 2147483647, %v305_v47  ;;  %v507_v42 = vmov 0.0  }
  0xff   :  { %v428_v57 = vpop.f32.mrb[0].mxu0 }
 0x100   :  { %v438_v58 = vpop.f32.mrb[0].mxu1  ;;  %v284_v61 = vmul.f32 %v428_v57, %v280_v31  ;;  %v324_v62 = vmul.f32 %v428_v57, %v320_v36  ;;  %v159_v1 = vpop.f32.mrb[1].mxu0  ;;  %v381_v36 = vand.u32 127, %v380_v35 }
 0x101   :  { %v296_v63 = vmul.f32 %v438_v58, %v292_v40  ;;  %v312_v0 = vmul.f32 %v438_v58, %v308_v44  ;;  %v256_v2 = vpop.f32.mrb[1].mxu1  ;;  %v283_v3 = vmul.f32 %v279_v45, %v159_v1  ;;  %v323_v4 = vmul.f32 %v319_v48, %v159_v1 }
 0x102   :  { %v295_v5 = vmul.f32 %v291_v49, %v256_v2  ;;  %v311_v6 = vmul.f32 %v307_v50, %v256_v2  ;;  %vm382_vm2 = vcmp.eq.s32.totalorder %v381_v36, 0 }
 0x103   :  { %v328_v7 = vadd.f32 %v324_v62, %v312_v0  ;;  %v300_v8 = vadd.f32 %v296_v63, %v284_v61  ;;  %v431_v9 = vpop.f32.mrb[2].mxu0 }
 0x104   :  { %v441_v10 = vpop.f32.mrb[2].mxu1  ;;  %v299_v11 = vadd.f32 %v295_v5, %v283_v3  ;;  %v327_v12 = vadd.f32 %v323_v4, %v311_v6  ;;  %v286_v13 = vmul.f32 %v431_v9, %v282_v51  ;;  %v326_v14 = vmul.f32 %v431_v9, %v322_v52  ;;  %v169_v17 = vpop.f32.mrb[3].mxu0 }
 0x105   :  { %v298_v15 = vmul.f32 %v441_v10, %v294_v53  ;;  %v314_v16 = vmul.f32 %v441_v10, %v310_v54  ;;  %v266_v18 = vpop.f32.mrb[3].mxu1  ;;  %v285_v19 = vmul.f32 %v281_v55, %v169_v17  ;;  %v325_v20 = vmul.f32 %v321_v56, %v169_v17 }
 0x106   :  { %v297_v21 = vmul.f32 %v293_v59, %v266_v18  ;;  %v313_v22 = vmul.f32 %v309_v60, %v266_v18  ;;  %v351_v23 = vsel %vm331_vm1, %v328_v7, 0.0  ;;  %v335_v24 = vsel %vm331_vm1, %v300_v8, 0.0 }
 0x107   :  { %v302_v25 = vadd.f32 %v298_v15, %v286_v13  ;;  %352 = vadd.xlane.f32.xlu1 %v351_v23  ;;  %336 = vadd.xlane.f32.xlu0 %v335_v24  ;;  %v330_v27 = vadd.f32 %v326_v14, %v314_v16  ;;  %v332_v30 = vsel %vm331_vm1, %v299_v11, 0.0  ;;  %v348_v32 = vsel %vm331_vm1, %v327_v12, 0.0 }
 0x108   :  { %v301_v26 = vadd.f32 %v297_v21, %v285_v19  ;;  %v329_v28 = vadd.f32 %v325_v20, %v313_v22 }
 0x109   :  { %v341_v29 = vsel %vm331_vm1, %v302_v25, 0.0  ;;  %v357_v33 = vsel %vm331_vm1, %v330_v27, 0.0 }
 0x10a   :  { %v338_v31 = vsel %vm331_vm1, %v301_v26, 0.0  ;;  %v354_v34 = vsel %vm331_vm1, %v329_v28, 0.0 }
 0x10b   :  { %342 = vadd.xlane.f32.xlu1 %v341_v29  ;;  %333 = vadd.xlane.f32.xlu0 %v332_v30 }
 0x10f   :  { %339 = vadd.xlane.f32.xlu1 %v338_v31  ;;  %349 = vadd.xlane.f32.xlu0 %v348_v32 }
 0x113   :  { %358 = vadd.xlane.f32.xlu1 %v357_v33  ;;  %355 = vadd.xlane.f32.xlu0 %v354_v34 }
 0x194   :  { %v353_v37 = vpop.xlane.xlu1 %352  ;;  %v337_v38 = vpop.xlane.xlu0 %336 }
 0x195   :  { %v361_v39 = vmul.f32 0.020833334, %v353_v37  ;;  %v345_v40 = vmul.f32 0.020833334, %v337_v38 }
 0x197   :  { %v365_v41 = vmin.f32 %v345_v40, %v361_v39  ;;  %vm369_vm4 = vcmp.lt.f32.partialorder %v345_v40, %v361_v39 }
 0x198   :  { %v407_v43 = vsel %vm369_vm4, 1.0, %v507_v42  ;;  %v343_v44 = vpop.xlane.xlu1 %342  ;;  %v334_v45 = vpop.xlane.xlu0 %333 }
 0x199   :  { %v384_v46 = vsel %vm382_vm2, %v365_v41, %v407_v43  ;;  %v344_v49 = vmul.f32 0.020833334, %v334_v45  ;;  %v347_v52 = vmul.f32 0.020833334, %v343_v44 }
 0x19a   :  { %389 = vst.msk [vmem:[%s675_s7 + $0x8] sm:$0xff] %vm387_vm3, %v384_v46 }
 0x19c   :  { %v340_v47 = vpop.xlane.xlu1 %339  ;;  %v350_v48 = vpop.xlane.xlu0 %349 }
 0x19d   :  { %v360_v50 = vmul.f32 0.020833334, %v350_v48  ;;  %v346_v56 = vmul.f32 0.020833334, %v340_v47 }
 0x19f   :  { %v364_v51 = vmin.f32 %v344_v49, %v360_v50  ;;  %vm368_vm5 = vcmp.lt.f32.partialorder %v344_v49, %v360_v50 }
 0x1a0   :  { %v406_v53 = vsel %vm368_vm5, 1.0, %v507_v42  ;;  %v359_v54 = vpop.xlane.xlu1 %358  ;;  %v356_v55 = vpop.xlane.xlu0 %355 }
 0x1a1   :  { %v383_v57 = vsel %vm382_vm2, %v364_v51, %v406_v53  ;;  %v363_v58 = vmul.f32 0.020833334, %v359_v54  ;;  %v362_v59 = vmul.f32 0.020833334, %v356_v55 }
 0x1a2   :  { %388 = vst.msk [vmem:[%s675_s7] sm:$0xff] %vm387_vm3, %v383_v57 }
 0x1a3   :  { %v367_v60 = vmin.f32 %v347_v52, %v363_v58  ;;  %vm371_vm6 = vcmp.lt.f32.partialorder %v347_v52, %v363_v58  ;;  %v366_v61 = vmin.f32 %v346_v56, %v362_v59  ;;  %vm370_vm7 = vcmp.lt.f32.partialorder %v346_v56, %v362_v59 }
 0x1a4   :  { %v409_v62 = vsel %vm371_vm6, 1.0, %v507_v42  ;;  %v408_v63 = vsel %vm370_vm7, 1.0, %v507_v42 }
 0x1a5   :  { %v386_v0 = vsel %vm382_vm2, %v367_v60, %v409_v62  ;;  %v385_v1 = vsel %vm382_vm2, %v366_v61, %v408_v63 }
 0x1a6   :  { %391 = vst.msk [vmem:[%s675_s7 + $0x18] sm:$0xff] %vm387_vm3, %v386_v0  ;;  %390 = vst.msk [vmem:[%s675_s7 + $0x10] sm:$0xff] %vm387_vm3, %v385_v1 }
 0x1a7   :  { %396 = vsyncpa [#allocation3], 1 }
 0x1a8   :  { %397 = vsyncpa [#allocation5], 1 }

</bundles_post_ra>
